<compile_context>
chip_gen: v5e
topology: v5e:2x2
jax: 0.10.0
libtpu: 0.0.40
codegen_flags: <defaults>
</compile_context>

<pallas_src>
import functools

import jax
import jax.numpy as jnp
from jax.experimental import pallas as pl
from jax.experimental.pallas import tpu as pltpu


# ----------------------------------------------------------------------------
# small helpers
# ----------------------------------------------------------------------------
def _round_up(v, m):
    return ((v + m - 1) // m) * m


def _choose_tm(M):
    # Small M: a single full block is strictly better than splitting (each grid
    # step costs ~0.35us and half-filled MXU rows).  Only tile when each tile
    # still keeps >= 256 rows.
    if M <= 256:
        return M
    for t in (1024, 512, 256):
        if M % t == 0 and M // t >= 2:
            return t
    return M


def _pad_last(a, target):
    pad = target - a.shape[-1]
    if pad == 0:
        return a
    cfg = [(0, 0)] * (a.ndim - 1) + [(0, pad)]
    return jnp.pad(a, cfg)


# ----------------------------------------------------------------------------
# Pallas kernel 1: fused (im2col) matmul + per-channel affine + optional ReLU
#   x: (TM, K) bf16, w: (K, CoutP) bf16, scale/shift: (1, CoutP) f32
#   out: (TM, CoutP) f32, CoutP a multiple of 128 -> lane-dense stores.
# ----------------------------------------------------------------------------
def _mm_affine_kernel(x_ref, w_ref, s_ref, t_ref, o_ref, *, relu):
    y = jnp.dot(x_ref[...], w_ref[...], preferred_element_type=jnp.float32)
    y = y * s_ref[...] + t_ref[...]
    if relu:
        y = jnp.maximum(y, 0.0)
    o_ref[...] = y


def mm_affine(x_bf16, w_bf16, scale, shift, relu):
    M, K = x_bf16.shape
    CoutP = w_bf16.shape[1]
    TM = _choose_tm(M)
    grid = (M // TM,)
    return pl.pallas_call(
        functools.partial(_mm_affine_kernel, relu=relu),
        out_shape=jax.ShapeDtypeStruct((M, CoutP), jnp.float32),
        grid_spec=pltpu.PrefetchScalarGridSpec(
            num_scalar_prefetch=0,
            grid=grid,
            in_specs=[
                pl.BlockSpec((TM, K), lambda i: (i, 0)),
                pl.BlockSpec((K, CoutP), lambda i: (0, 0)),
                pl.BlockSpec((1, CoutP), lambda i: (0, 0)),
                pl.BlockSpec((1, CoutP), lambda i: (0, 0)),
            ],
            out_specs=pl.BlockSpec((TM, CoutP), lambda i: (i, 0)),
        ),
        compiler_params=pltpu.CompilerParams(dimension_semantics=("parallel",)),
    )(x_bf16, w_bf16, scale, shift)


# ----------------------------------------------------------------------------
# Pallas kernel 2: fused depthnet tail over pixel rows
#   conv5 (3x3, via K=9*MID im2col built in the wrapper) -> BN/ReLU
#   -> conv6 (1x1, padded to 128 output lanes) -> softmax over D
#   -> depth x feature outer product via two constant 0/1 expansion matmuls.
#   Output (TM, D*C) f32, lane-dense (D*C = 128 in this config).
# ----------------------------------------------------------------------------
def _head_tail_kernel(x5_ref, w5_ref, s5_ref, t5_ref, w6_ref, b6_ref,
                      ed_ref, ec_ref, o_ref, *, D, C):
    out5 = jnp.dot(x5_ref[...], w5_ref[...], preferred_element_type=jnp.float32)
    out5 = jnp.maximum(out5 * s5_ref[...] + t5_ref[...], 0.0)
    z = jnp.dot(out5.astype(jnp.bfloat16), w6_ref[...],
                preferred_element_type=jnp.float32) + b6_ref[...]
    logits = z[:, :D]
    feat = z[:, D:D + C]
    m = jnp.max(logits, axis=1, keepdims=True)
    e = jnp.exp(logits - m)
    depth = e / jnp.sum(e, axis=1, keepdims=True)           # exact divide (parity)
    # outer product: column d*C + c = depth[:, d] * feat[:, c], built from two
    # constant selector matmuls (MXU has slack here) + one VPU multiply.
    dexp = jnp.dot(depth, ed_ref[...], preferred_element_type=jnp.float32)
    fexp = jnp.dot(feat, ec_ref[...], preferred_element_type=jnp.float32)
    o_ref[...] = dexp * fexp


def depth_head_tail(x5_bf16, w5, s5, t5, w6, b6, D, C):
    M, K5 = x5_bf16.shape
    MID = w5.shape[0]
    w5mat = w5.transpose(2, 3, 1, 0).reshape(K5, MID).astype(jnp.bfloat16)
    NP6 = _round_up(D + C, 128)                              # pad conv6 lanes -> 128
    w6mat = _pad_last(w6.reshape(D + C, MID).T, NP6).astype(jnp.bfloat16)
    b6v = b6 if b6 is not None else jnp.zeros((D + C,), jnp.float32)
    b6p = _pad_last(b6v.reshape(1, D + C), NP6)
    dc = D * C
    col = jnp.arange(dc)
    ed = (col[None, :] // C == jnp.arange(D)[:, None]).astype(jnp.float32)   # (D, D*C)
    ec = (col[None, :] % C == jnp.arange(C)[:, None]).astype(jnp.float32)    # (C, D*C)
    TM = _choose_tm(M)
    grid = (M // TM,)
    return pl.pallas_call(
        functools.partial(_head_tail_kernel, D=D, C=C),
        out_shape=jax.ShapeDtypeStruct((M, dc), jnp.float32),
        grid_spec=pltpu.PrefetchScalarGridSpec(
            num_scalar_prefetch=0,
            grid=grid,
            in_specs=[
                pl.BlockSpec((TM, K5), lambda i: (i, 0)),
                pl.BlockSpec((K5, MID), lambda i: (0, 0)),
                pl.BlockSpec((1, MID), lambda i: (0, 0)),
                pl.BlockSpec((1, MID), lambda i: (0, 0)),
                pl.BlockSpec((MID, NP6), lambda i: (0, 0)),
                pl.BlockSpec((1, NP6), lambda i: (0, 0)),
                pl.BlockSpec((D, dc), lambda i: (0, 0)),
                pl.BlockSpec((C, dc), lambda i: (0, 0)),
            ],
            out_specs=pl.BlockSpec((TM, dc), lambda i: (i, 0)),
        ),
        compiler_params=pltpu.CompilerParams(dimension_semantics=("parallel",)),
    )(x5_bf16, w5mat, s5.reshape(1, MID), t5.reshape(1, MID), w6mat, b6p, ed, ec)


# ----------------------------------------------------------------------------
# Pallas kernel 3: BEV mean-pool (scatter-mean via bf16 one-hot matmul).
#   Grid = (voxel-row tiles "parallel", point tiles "arbitrary"); the output
#   block is resident across the point axis and acts as the accumulator, so the
#   VMEM footprint is bounded by the voxel tile (v7x 64 MiB safe) and the voxel
#   axis shards across v7x's two TensorCores.
# ----------------------------------------------------------------------------
def _bev_pool_kernel(idx_ref, f_ref, o_ref, *, C, TV):
    @pl.when(pl.program_id(1) == 0)
    def _():
        o_ref[...] = jnp.zeros_like(o_ref)

    tm = f_ref.shape[0]
    base = pl.program_id(0) * TV
    vox = jax.lax.broadcasted_iota(jnp.int32, (TV, tm), 0) + base
    onehot = (vox == idx_ref[...]).astype(jnp.bfloat16)      # exact in bf16
    o_ref[...] += jnp.dot(onehot, f_ref[...], preferred_element_type=jnp.float32)

    @pl.when(pl.program_id(1) == pl.num_programs(1) - 1)
    def _():
        acc = o_ref[...]
        cnt = jnp.maximum(acc[:, C:C + 1], 1.0)
        o_ref[...] = acc / cnt                               # exact mean-pool divide


def bev_pool_pallas(feats, flat_idx, nvox, C, tm=512, tv=512):
    Np = feats.shape[0]
    CP = _round_up(C + 1, 128)
    TV = min(tv, _round_up(nvox, 8))
    NVOXP = _round_up(nvox, TV)
    tm = min(tm, _round_up(Np, 8))
    NpP = _round_up(Np, tm)
    f = jnp.zeros((NpP, CP), jnp.float32)
    f = f.at[:Np, :C].set(feats)
    f = f.at[:Np, C].set(1.0)                                # count column
    f = f.astype(jnp.bfloat16)
    idx = jnp.full((1, NpP), -1, jnp.int32)
    idx = idx.at[0, :Np].set(flat_idx.astype(jnp.int32))
    grid = (NVOXP // TV, NpP // tm)
    out = pl.pallas_call(
        functools.partial(_bev_pool_kernel, C=C, TV=TV),
        out_shape=jax.ShapeDtypeStruct((NVOXP, CP), jnp.float32),
        grid_spec=pltpu.PrefetchScalarGridSpec(
            num_scalar_prefetch=0,
            grid=grid,
            in_specs=[
                pl.BlockSpec((1, tm), lambda v, i: (0, i)),
                pl.BlockSpec((tm, CP), lambda v, i: (i, 0)),
            ],
            out_specs=pl.BlockSpec((TV, CP), lambda v, i: (v, 0)),
        ),
        compiler_params=pltpu.CompilerParams(
            dimension_semantics=("parallel", "arbitrary")),
    )(idx, f)
    return out[:nvox, :C]


# ----------------------------------------------------------------------------
# Conv glue: NHWC im2col (tap-major columns -> no transpose) and BN folding.
# All matmul compute runs in the Pallas kernels above.
# ----------------------------------------------------------------------------
def _im2col_nhwc(x_nhwc, kh, kw, stride, pad):
    N, H, W, C = x_nhwc.shape
    xp = jnp.pad(x_nhwc, ((0, 0), (pad, pad), (pad, pad), (0, 0)))
    oh = (H + 2 * pad - kh) // stride + 1
    ow = (W + 2 * pad - kw) // stride + 1
    slabs = []
    for i in range(kh):
        for j in range(kw):
            slabs.append(xp[:, i:i + stride * oh:stride, j:j + stride * ow:stride, :])
    patches = jnp.concatenate(slabs, axis=-1)          # (N, oh, ow, kh*kw*C)
    return patches.reshape(N * oh * ow, kh * kw * C), oh, ow


def _fold_bn(bn, bias, cout):
    if bn is None:
        scale = jnp.ones((cout,), jnp.float32)
        shift = bias if bias is not None else jnp.zeros((cout,), jnp.float32)
        return scale, shift
    gamma, beta, mean, var, eps = bn
    inv = gamma / jnp.sqrt(var + eps)
    shift = beta - mean * inv
    if bias is not None:
        shift = shift + bias * inv
    return inv, shift


def conv2d_bn_relu_nhwc(x_nhwc, w, bias, bn, relu, stride, pad):
    """Conv2d (NHWC glue, weights in PyTorch OIHW) + BN (eval) + optional ReLU."""
    N = x_nhwc.shape[0]
    Cout, Cin, kh, kw = w.shape
    patches, oh, ow = _im2col_nhwc(x_nhwc, kh, kw, stride, pad)
    CoutP = _round_up(Cout, 128)
    wmat = w.transpose(2, 3, 1, 0).reshape(kh * kw * Cin, Cout)
    wmat = _pad_last(wmat, CoutP).astype(jnp.bfloat16)
    scale, shift = _fold_bn(bn, bias, Cout)
    y = mm_affine(patches.astype(jnp.bfloat16), wmat,
                  _pad_last(scale.reshape(1, Cout), CoutP),
                  _pad_last(shift.reshape(1, Cout), CoutP), relu)
    return y.reshape(N, oh, ow, CoutP)[..., :Cout]


# ----------------------------------------------------------------------------
# Module
# ----------------------------------------------------------------------------
def gen_dx_bx(xbound, ybound, zbound):
    dx = jnp.array([row[2] for row in (xbound, ybound, zbound)], jnp.float32)
    bx = jnp.array([row[0] + row[2] / 2.0 for row in (xbound, ybound, zbound)], jnp.float32)
    nx = tuple(int((row[1] - row[0]) / row[2]) for row in (xbound, ybound, zbound))
    return dx, bx, nx


def _init_conv(key, cout, cin, kh, kw, bias=True):
    k1, k2 = jax.random.split(key)
    fan_in = float(cin * kh * kw)
    w = jax.random.normal(k1, (cout, cin, kh, kw), jnp.float32) * (fan_in ** -0.5)
    b = jax.random.normal(k2, (cout,), jnp.float32) * 0.01 if bias else None
    return w, b


def _init_bn(cout, idx):
    gamma = 1.0 + 0.01 * jnp.arange(cout, dtype=jnp.float32) / cout
    beta = 0.01 * jnp.cos(jnp.arange(cout, dtype=jnp.float32) + idx)
    mean = jnp.zeros((cout,), jnp.float32)
    var = jnp.ones((cout,), jnp.float32)
    return (gamma, beta, mean, var, 1e-5)   # eval-mode BatchNorm (running stats)


class DepthLSSTransformPallas:
    def __init__(self, in_channels, out_channels, image_size, feature_size,
                 xbound, ybound, zbound, dbound, downsample=1, key=None):
        self.in_channels = in_channels
        self.image_size = image_size
        self.feature_size = feature_size
        self.dx, self.bx, self.nx = gen_dx_bx(xbound, ybound, zbound)
        self.dbound = dbound
        self.C = out_channels
        self.frustum = self._create_frustum()
        self.D = int(self.frustum.shape[0])
        assert downsample == 1  # TODO(synk): downsample==2 conv head not built for this synthetic config.

        key = jax.random.PRNGKey(1234) if key is None else key
        ks = jax.random.split(key, 8)
        # dtransform
        self.w1, self.b1 = _init_conv(ks[0], 8, 1, 1, 1)
        self.bn1 = _init_bn(8, 0)
        self.w2, self.b2 = _init_conv(ks[1], 32, 8, 5, 5)
        self.bn2 = _init_bn(32, 1)
        self.w3, self.b3 = _init_conv(ks[2], 64, 32, 5, 5)
        self.bn3 = _init_bn(64, 2)
        # depthnet
        self.w4, self.b4 = _init_conv(ks[3], in_channels, in_channels + 64, 3, 3)
        self.bn4 = _init_bn(in_channels, 3)
        self.w5, self.b5 = _init_conv(ks[4], in_channels, in_channels, 3, 3)
        self.bn5 = _init_bn(in_channels, 4)
        self.w6, self.b6 = _init_conv(ks[5], self.D + self.C, in_channels, 1, 1)

    def _create_frustum(self):
        iH, iW = self.image_size
        fH, fW = self.feature_size
        ds = jnp.arange(self.dbound[0], self.dbound[1], self.dbound[2], dtype=jnp.float32)
        D = ds.shape[0]
        ds = jnp.broadcast_to(ds.reshape(D, 1, 1), (D, fH, fW))
        xs = jnp.broadcast_to(jnp.linspace(0.0, iW - 1, fW, dtype=jnp.float32).reshape(1, 1, fW), (D, fH, fW))
        ys = jnp.broadcast_to(jnp.linspace(0.0, iH - 1, fH, dtype=jnp.float32).reshape(1, fH, 1), (D, fH, fW))
        return jnp.stack([xs, ys, ds], -1)            # (D, fH, fW, 3)

    # ---------------- geometry (plain JAX glue) ----------------
    def get_geometry(self, c2l_rots, c2l_trans, intrins, post_rots, post_trans,
                     extra_rots, extra_trans):
        B, N, _ = c2l_trans.shape
        points = self.frustum[None, None] - post_trans.reshape(B, N, 1, 1, 1, 3)
        inv_post = jnp.linalg.inv(post_rots)
        points = jnp.einsum('bnij,bndhwj->bndhwi', inv_post, points)
        points = jnp.concatenate(
            [points[..., :2] * points[..., 2:3], points[..., 2:3]], axis=-1)
        combine = jnp.matmul(c2l_rots, jnp.linalg.inv(intrins))
        points = jnp.einsum('bnij,bndhwj->bndhwi', combine, points)
        points = points + c2l_trans.reshape(B, N, 1, 1, 1, 3)
        points = jnp.einsum('bij,bndhwj->bndhwi', extra_rots, points)
        points = points + extra_trans.reshape(B, 1, 1, 1, 1, 3)
        return points                                  # (B,N,D,fH,fW,3)

    # ---------------- camera features ----------------
    def get_cam_feats(self, x, d):
        B, N, C_in, fH, fW = x.shape
        iH, iW = self.image_size
        BN = B * N
        D, C = self.D, self.C

        # --- dtransform ---
        # conv1 (1x1, Cin=1)+BN+ReLU is a per-pixel affine; it is folded into the
        # conv2 im2col operand (per-cin lane blocks, taps padded 25->32), so the
        # whole stem is ONE K=256 bf16 matmul with a fused BN/ReLU epilogue.
        d_nhwc = d.reshape(BN, 1, iH, iW).transpose(0, 2, 3, 1)        # (BN,iH,iW,1)
        ones = jnp.ones((BN, iH, iW, 1), jnp.float32)
        dpatch, oh2, ow2 = _im2col_nhwc(d_nhwc, 5, 5, 4, 2)            # (BN*16*16, 25)
        dmask, _, _ = _im2col_nhwc(ones, 5, 5, 4, 2)                   # valid-tap mask
        inv1, shift1 = _fold_bn(self.bn1, self.b1, 8)
        a1 = self.w1.reshape(8) * inv1
        M2 = dpatch.shape[0]
        v = jnp.maximum(dpatch[:, None, :] * a1[None, :, None]
                        + shift1[None, :, None], 0.0)                  # (M2, 8, 25)
        v = v * dmask[:, None, :]                                      # conv2 zero pad
        v = jnp.pad(v, ((0, 0), (0, 0), (0, 32 - 25)))                 # lane-align taps
        packed = v.reshape(M2, 8 * 32).astype(jnp.bfloat16)
        w2mat = self.w2.transpose(1, 2, 3, 0).reshape(8, 25, 32)       # [cin, tap, co]
        w2mat = jnp.pad(w2mat, ((0, 0), (0, 32 - 25), (0, 0))).reshape(8 * 32, 32)
        CoutP2 = _round_up(32, 128)
        scale2, shift2 = _fold_bn(self.bn2, self.b2, 32)
        d2 = mm_affine(packed, _pad_last(w2mat, CoutP2).astype(jnp.bfloat16),
                       _pad_last(scale2.reshape(1, 32), CoutP2),
                       _pad_last(shift2.reshape(1, 32), CoutP2), relu=True)
        d2 = d2.reshape(BN, oh2, ow2, CoutP2)[..., :32]                # (BN,16,16,32)
        d3 = conv2d_bn_relu_nhwc(d2, self.w3, self.b3, self.bn3, True, 2, 2)  # (BN,fH,fW,64)

        # --- depthnet ---
        x_nhwc = x.reshape(BN, C_in, fH, fW).transpose(0, 2, 3, 1)     # (BN,fH,fW,Cin)
        h0 = jnp.concatenate([d3, x_nhwc], axis=-1)                    # (BN,fH,fW,Cin+64)
        # conv4: single big-K (9*(Cin+64)) bf16 im2col matmul + fused BN/ReLU
        out4 = conv2d_bn_relu_nhwc(h0, self.w4, self.b4, self.bn4, True, 1, 1)
        # conv5 + conv6 + softmax + outer product: one fused kernel over pixel rows
        x5, _, _ = _im2col_nhwc(out4, 3, 3, 1, 1)                      # (BN*fH*fW, 9*Cin)
        scale5, shift5 = _fold_bn(self.bn5, self.b5, self.in_channels)
        head = depth_head_tail(x5.astype(jnp.bfloat16), self.w5, scale5, shift5,
                               self.w6, self.b6, D, C)                 # (BN*fH*fW, D*C)
        head = head.reshape(BN, fH, fW, D, C)
        out = head.transpose(0, 3, 1, 2, 4)                            # (BN, D, fH, fW, C)
        return out.reshape(B, N, D, fH, fW, C)

    # ---------------- BEV pooling ----------------
    def bev_pool(self, geom_feats, x):
        B, N, D, H, W, C = x.shape
        Nprime = B * N * D * H * W
        nx0, nx1, nx2 = self.nx
        x = x.reshape(Nprime, C)
        geom = ((geom_feats - (self.bx - self.dx / 2.0)) / self.dx).astype(jnp.int32)  # trunc == .long()
        geom = geom.reshape(Nprime, 3)
        batch_ix = jnp.repeat(jnp.arange(B, dtype=jnp.int32), Nprime // B)
        kept = ((geom[:, 0] >= 0) & (geom[:, 0] < nx0) &
                (geom[:, 1] >= 0) & (geom[:, 1] < nx1) &
                (geom[:, 2] >= 0) & (geom[:, 2] < nx2))
        flat = ((batch_ix * nx2 + geom[:, 2]) * nx0 + geom[:, 0]) * nx1 + geom[:, 1]
        flat = jnp.where(kept, flat, -1)
        nvox = B * nx2 * nx0 * nx1
        pooled = bev_pool_pallas(x, flat, nvox, C)                 # (nvox, C) mean-pool
        pooled = pooled.reshape(B, nx2, nx0, nx1, C)               # (B, Z, X, Y, C)
        pooled = pooled.transpose(0, 1, 4, 2, 3)                   # (B, Z, C, X, Y)
        final = pooled.reshape(B, nx2 * C, nx0, nx1)               # cat(unbind(dim=Z), ch)
        return final

    # ---------------- forward ----------------
    def __call__(self, img, points, lidar2camera, lidar2image, cam_intrinsic,
                 camera2lidar, img_aug_matrix, lidar_aug_matrix, metas=None):
        intrins = cam_intrinsic[..., :3, :3]
        post_rots = img_aug_matrix[..., :3, :3]
        post_trans = img_aug_matrix[..., :3, 3]
        c2l_rots = camera2lidar[..., :3, :3]
        c2l_trans = camera2lidar[..., :3, 3]

        B = len(points)
        N = img.shape[1]
        iH, iW = self.image_size
        depth = jnp.zeros((B, N, 1, iH, iW), jnp.float32)
        for b in range(B):
            cur = points[b][:, :3]
            cur = cur - lidar_aug_matrix[b, :3, 3]
            cur = jnp.linalg.inv(lidar_aug_matrix[b, :3, :3]) @ cur.T          # (3, P)
            cur = jnp.einsum('nij,jp->nip', lidar2image[b, :, :3, :3], cur)    # (N, 3, P)
            cur = cur + lidar2image[b, :, :3, 3][:, :, None]
            z = jnp.clip(cur[:, 2, :], 1e-5, 1e5)
            dist = z                                                            # clamped view semantics
            xy = cur[:, :2, :] / z[:, None, :]
            cur = jnp.concatenate([xy, z[:, None, :]], axis=1)
            cur = jnp.einsum('nij,njp->nip', img_aug_matrix[b, :, :3, :3], cur)
            cur = cur + img_aug_matrix[b, :, :3, 3][:, :, None]
            coords = jnp.transpose(cur[:, :2, :], (0, 2, 1))[..., ::-1]         # (N, P, 2) [y, x]
            on_img = ((coords[..., 0] < iH) & (coords[..., 0] >= 0) &
                      (coords[..., 1] < iW) & (coords[..., 1] >= 0))
            for c in range(N):
                yi = coords[c, :, 0].astype(jnp.int32)
                xi = coords[c, :, 1].astype(jnp.int32)
                yi = jnp.where(on_img[c], yi, iH)   # push masked points OOB -> dropped
                xi = jnp.where(on_img[c], xi, iW)
                depth = depth.at[b, c, 0, yi, xi].set(dist[c], mode='drop')

        extra_rots = lidar_aug_matrix[..., :3, :3]
        extra_trans = lidar_aug_matrix[..., :3, 3]
        geom = self.get_geometry(c2l_rots, c2l_trans, intrins, post_rots, post_trans,
                                 extra_rots, extra_trans)
        x = self.get_cam_feats(img, depth)
        x = self.bev_pool(geom, x)
        return x   # downsample == 1 -> nn.Identity


# ----------------------------------------------------------------------------
# main
# ----------------------------------------------------------------------------
if __name__ == "__main__":
    in_channels = 32
    out_channels = 16
    image_size = (64, 64)
    feature_size = (8, 8)        # image_size / 8 (dtransform strides 4 * 2)
    xbound = (-4.0, 4.0, 1.0)    # nx = 8
    ybound = (-4.0, 4.0, 1.0)    # ny = 8
    zbound = (-2.0, 2.0, 4.0)    # nz = 1
    dbound = (1.0, 9.0, 1.0)     # D  = 8
    B, N, P = 1, 2, 128

    model = DepthLSSTransformPallas(in_channels, out_channels, image_size, feature_size,
                                    xbound, ybound, zbound, dbound, downsample=1,
                                    key=jax.random.PRNGKey(42))

    root = jax.random.PRNGKey(0)
    k_img, k_pts = jax.random.split(root)
    img = jax.random.normal(k_img, (B, N, in_channels, *feature_size), jnp.float32)

    points = []
    for b in range(B):
        kb = jax.random.fold_in(k_pts, b)
        xy = jax.random.uniform(jax.random.fold_in(kb, 0), (P, 2), jnp.float32,
                                minval=0.5, maxval=4.0)
        zz = jax.random.uniform(jax.random.fold_in(kb, 1), (P, 1), jnp.float32,
                                minval=-1.0, maxval=1.0)
        pts = jnp.concatenate([xy, zz, jnp.ones((P, 1), jnp.float32)], axis=1)
        points.append(pts)

    def make_se3(R, t):
        M = jnp.eye(4, dtype=jnp.float32)
        M = M.at[:3, :3].set(R)
        M = M.at[:3, 3].set(t)
        return M

    # camera frame (x right, y down, z forward) -> lidar frame (x fwd, y left, z up)
    R_c2l = jnp.array([[0., 0., 1.],
                       [-1., 0., 0.],
                       [0., -1., 0.]], jnp.float32)
    camera2lidar = jnp.stack(
        [make_se3(R_c2l, jnp.array([0.2 * n, 0.1, 0.3], jnp.float32)) for n in range(N)]
    )[None]
    camera2lidar = jnp.broadcast_to(camera2lidar, (B, N, 4, 4))

    Kmat = jnp.array([[32., 0., 32., 0.],
                      [0., 32., 32., 0.],
                      [0., 0., 1., 0.],
                      [0., 0., 0., 1.]], jnp.float32)
    cam_intrinsic = jnp.broadcast_to(Kmat, (B, N, 4, 4))

    lidar2camera = jnp.linalg.inv(camera2lidar)
    lidar2image = jnp.einsum('bnij,bnjk->bnik', cam_intrinsic, lidar2camera)

    aug = jnp.eye(4, dtype=jnp.float32)
    aug = aug.at[0, 0].set(0.9).at[1, 1].set(0.9).at[0, 3].set(2.0).at[1, 3].set(1.0)
    img_aug_matrix = jnp.broadcast_to(aug, (B, N, 4, 4))

    th = 0.05
    Rz = jnp.array([[jnp.cos(th), -jnp.sin(th), 0.],
                    [jnp.sin(th), jnp.cos(th), 0.],
                    [0., 0., 1.]], jnp.float32)
    lidar_aug_matrix = jnp.broadcast_to(
        make_se3(Rz, jnp.array([0.1, -0.1, 0.0], jnp.float32)), (B, 4, 4))

    out = model(img, points, lidar2camera, lidar2image, cam_intrinsic,
                camera2lidar, img_aug_matrix, lidar_aug_matrix, metas=None)
    out = jax.block_until_ready(out)
    assert out.shape == (B, out_channels * model.nx[2], model.nx[0], model.nx[1])
    print("KERNEL_OK")
</pallas_src>

<mosaic_0001>
module attributes {stable_mosaic.version = 11 : i64} {
  func.func @_mm_affine_kernel(%arg0: i32, %arg1: memref<256x256xbf16, #tpu.memory_space<vmem>>, %arg2: memref<256x128xbf16, #tpu.memory_space<vmem>>, %arg3: memref<1x128xf32, #tpu.memory_space<vmem>>, %arg4: memref<1x128xf32, #tpu.memory_space<vmem>>, %arg5: memref<256x128xf32, #tpu.memory_space<vmem>>) attributes {dimension_semantics = [#tpu.dimension_semantics<parallel>], iteration_bounds = array<i64: 2>, scalar_prefetch = 0 : i64, scratch_operands = 0 : i64, tpu.core_type = #tpu.core_type<tc>, window_params = [{transform_indices = @transform_0, window_bounds = array<i64: 256, 256>}, {pipeline_mode = #tpu.pipeline_mode<synchronous>, transform_indices = @transform_1, window_bounds = array<i64: 256, 128>}, {pipeline_mode = #tpu.pipeline_mode<synchronous>, transform_indices = @transform_2, window_bounds = array<i64: 1, 128>}, {pipeline_mode = #tpu.pipeline_mode<synchronous>, transform_indices = @transform_3, window_bounds = array<i64: 1, 128>}, {transform_indices = @transform_4, window_bounds = array<i64: 256, 128>}]} {
    %c0 = arith.constant 0 : index
    %c0_0 = arith.constant 0 : index
    %0 = vector.load %arg1[%c0, %c0_0] : memref<256x256xbf16, #tpu.memory_space<vmem>>, vector<256x256xbf16>
    %c0_1 = arith.constant 0 : index
    %c0_2 = arith.constant 0 : index
    %1 = vector.load %arg2[%c0_1, %c0_2] : memref<256x128xbf16, #tpu.memory_space<vmem>>, vector<256x128xbf16>
    %cst = arith.constant dense<0.000000e+00> : vector<256x128xf32>
    %2 = tpu.matmul %0, %1, %cst {dimension_numbers = #tpu.dot_dimension_numbers<[1], [0], [0], [1], [0, 0, 1, 1], [], []>} : vector<256x256xbf16>, vector<256x128xbf16>, vector<256x128xf32> -> vector<256x128xf32>
    %c0_3 = arith.constant 0 : index
    %c0_4 = arith.constant 0 : index
    %3 = vector.load %arg3[%c0_3, %c0_4] : memref<1x128xf32, #tpu.memory_space<vmem>>, vector<1x128xf32>
    %4 = vector.broadcast %3 : vector<1x128xf32> to vector<256x128xf32>
    %5 = arith.mulf %2, %4 : vector<256x128xf32>
    %c0_5 = arith.constant 0 : index
    %c0_6 = arith.constant 0 : index
    %6 = vector.load %arg4[%c0_5, %c0_6] : memref<1x128xf32, #tpu.memory_space<vmem>>, vector<1x128xf32>
    %7 = vector.broadcast %6 : vector<1x128xf32> to vector<256x128xf32>
    %8 = arith.addf %5, %7 : vector<256x128xf32>
    %cst_7 = arith.constant 0.000000e+00 : f32
    %9 = vector.broadcast %cst_7 : f32 to vector<256x128xf32>
    %10 = arith.maximumf %8, %9 : vector<256x128xf32>
    %c0_8 = arith.constant 0 : index
    %c0_9 = arith.constant 0 : index
    %11 = vector.load %arg5[%c0_8, %c0_9] : memref<256x128xf32, #tpu.memory_space<vmem>>, vector<256x128xf32>
    tpu.vector_store %arg5[%c0_8, %c0_9], %10 {strides = array<i32>} : memref<256x128xf32, #tpu.memory_space<vmem>>, vector<256x128xf32>,
    return
  }
  func.func @transform_0(%arg0: i32) -> (i32, i32) {
    %c0_i32 = arith.constant 0 : i32
    %c0_i32_0 = arith.constant 0 : i32
    return %arg0, %c0_i32 : i32, i32
  }
  func.func @transform_1(%arg0: i32) -> (i32, i32) {
    %c0_i32 = arith.constant 0 : i32
    %c0_i32_0 = arith.constant 0 : i32
    %c0_i32_1 = arith.constant 0 : i32
    return %c0_i32, %c0_i32_0 : i32, i32
  }
  func.func @transform_2(%arg0: i32) -> (i32, i32) {
    %c0_i32 = arith.constant 0 : i32
    %c0_i32_0 = arith.constant 0 : i32
    %c0_i32_1 = arith.constant 0 : i32
    return %c0_i32, %c0_i32_0 : i32, i32
  }
  func.func @transform_3(%arg0: i32) -> (i32, i32) {
    %c0_i32 = arith.constant 0 : i32
    %c0_i32_0 = arith.constant 0 : i32
    %c0_i32_1 = arith.constant 0 : i32
    return %c0_i32, %c0_i32_0 : i32, i32
  }
  func.func @transform_4(%arg0: i32) -> (i32, i32) {
    %c0_i32 = arith.constant 0 : i32
    %c0_i32_0 = arith.constant 0 : i32
    return %arg0, %c0_i32 : i32, i32
  }
}

</mosaic_0001>

<bundles_post_ra>
// kernel: tpu_custom_call.1
= control target key start
LH: loop header
LB: loop body
LE: loop exit
PB: predicated region body
PF: predicated region fallthrough
CT: control target
= control target key end

     0   :  { %9 = vsyncpa [#allocation3], 0  ;;  %s1795_s0 = inlined_call_operand.hbm [shape: bf16[512,256], index: 0, kind: input, shape index: {}]   ;;  %s1796_s1 = inlined_call_operand.hbm [shape: bf16[256,128], index: 1, kind: input, shape index: {}]   ;;  %s1797_s2 = inlined_call_operand.vmem [shape: f32[1,128], index: 2, kind: input, shape index: {}]   ;;  %s1798_s3 = inlined_call_operand.vmem [shape: f32[1,128], index: 3, kind: input, shape index: {}]   ;;  %s1799_s4 = inlined_call_operand.hbm [shape: f32[512,128], index: 4, kind: output, shape index: {}]  }
   0x1   :  { %11 = vsyncpa [#allocation3 + $0x1], 0 }
   0x2   :  { %12 = vsyncpa [#allocation6], 0 }
   0x3   :  { %13 = vsyncpa [#allocation4], 0 }
   0x4   :  { %15 = vsyncpa [#allocation4 + $0x1], 0  ;;  %s1476_s15 = smov 0   ;;  %s1478_s16 = smov 0  }
   0x5   :  { %s1480_s17 = smov 0   ;;  %s1482_s18 = smov 0  }
   0x6 LB: > { %s1497_s19 = sadd.s32 4294967295, %s1442_s18   ;;  %s971_s20 = sadd.s32 4294967294, %s1442_s18   ;;  %s1442_s18 = sphi %s1482_s18, %s1809_s18   ;;  %s1438_s17 = sphi %s1480_s17, %s1808_s17   ;;  %s1434_s16 = sphi %s1478_s16, %s1807_s16   ;;  %s1430_s15 = sphi %s1476_s15, %s1806_s15  }
   0x7   : > { %p41_p0 = scmp.ne.s32.totalorder %s1434_s16, %s1430_s15  ;;  %p42_p1 = scmp.eq.s32.totalorder %s1497_s19, 0 }
   0x8   : > { %p128_p2 = scmp.eq.s32.totalorder %s1497_s19, 1  ;;  %p134_p3 = scmp.eq.s32.totalorder %s971_s20, 1 }
   0x9   : > { %p1506_p4 = por %p42_p1, %p41_p0  ;;  %p972_p5 = scmp.ge.s32.totalorder %s1442_s18, 1 }
   0xa   : > { %p1511_p6 = por %p134_p3, %p41_p0  ;;  %p141_p7 = scmp.lt.s32.totalorder %s1442_s18, 3 }
   0xb   : > { %s152_s25 = sshll.u32 %s1796_s1, 4  ;;  %s1444_s27 = smov [#allocation5]   ;;  %s153_s25 = int_to_ptr.hbm [resolvable:$true] %s152_s25 }
   0xc   : > { %p1519_p8 = pnand %p972_p5, %p141_p7  ;;  %s154_s28 = sshll.u32 %s1444_s27, 4  ;;  %s155_s28 = int_to_ptr.vmem [resolvable:$true] %s154_s28 }
   0xd   : > { %s1529_s29 = sadd.s32 1, %s1442_s18   ;;  %s1445_s30 = smov 64  }
   0xe   : > { %p1255_p9 = pneg %p1519_p8  ;;  %s1446_s5 = smov 4  }
   0xf   : > { %s25_s6 = ssub.s32 %s1442_s18, %s1529_s29  ;;  %s28_s7 = sadd.s32 1, %s1438_s17 }
  0x10   : > { %p1256_p10 = pnand %p1255_p9, %p42_p1  ;;  %p26_p12 = scmp.eq.s32.totalorder %s25_s6, 0 }
  0x11   : > { %p35_p13 = scmp.ne.s32.totalorder %s1438_s17, %s1434_s16  ;;  %p36_p0 = scmp.eq.s32.totalorder %s1442_s18, 0 }
  0x12   : > { %1258 = dma.hbm_to_vmem [thread:$0]  (!%p1256_p10), %s153_s25, 2048, %s155_s28, [#allocation6], %s1445_s30, %s1445_s30, %s1446_s5  }
  0x13   : > { %p1268_p3 = scmp.lt.s32.totalorder %s1442_s18, 2  ;;  %p37_p5 = por %p36_p0, %p35_p13 }
  0x14   : > { %s1539_s8 = scalar_select %p26_p12, %s1438_s17, %s28_s7  }
  0x15   : > { %p1543_p7 = por %p128_p2, %p35_p13  ;;  %s174_s10 = sand.u32 1, %s1438_s17  }
  0x16   : > { %s1181_s11 = sshll.u32 %s1442_s18, 8  ;;  %s975_s12 = sshll.u32 %s174_s10, 8 }
  0x17   : > { %s184_s20 = scalar_lea.hbm %s1795_s0, %s1181_s11  ;;  %s178_s24 = scalar_lea.vmem [#allocation2], %s975_s12 }
  0x18   : > { %s185_s23 = sshll.u32 %s184_s20, 4  ;;  %s187_s25 = sshll.u32 %s178_s24, 4  ;;  %s186_s23 = int_to_ptr.hbm [resolvable:$true] %s185_s23  ;;  %s188_s25 = int_to_ptr.vmem [resolvable:$true] %s187_s25 }
  0x19   : > { %p1554_p9 = pnand %p1268_p3, %p37_p5  ;;  %s175_s28 = scalar_lea.sflag [#allocation3], %s174_s10 }
  0x1a   : > { %s1342_s30 = sshra.s32 %s186_s23, 4  ;;  %s1349_s11 = scalar_lea.hbm %s1795_s0, 512  ;;  %s1343_s30 = int_to_ptr.hbm [resolvable:$true] %s1342_s30 }
  0x1b   : > { %s1344_s5 = scalar_lea.hbm %s1343_s30, 256  ;;  %p1346_p10 = pneg %p1554_p9 }
  0x1c   : > { %p1345_p2 = scmp.ne.s32.totalorder %s1343_s30, %s1344_s5  ;;  %p1350_p0 = scmp.lt.s32.totalorder %s1343_s30, %s1795_s0 }
  0x1d   : > { %p1351_p3 = scmp.lt.s32.totalorder %s1349_s11, %s1344_s5 }
  0x1e   : > { %p1347_p12 = pnand %p1346_p10, %p1345_p2 }
  0x1f   : > { %p1352_p5 = por %p1351_p3, %p1350_p0 }
  0x20   : > { %p1348_p13 = pneg %p1347_p12 }
  0x22   : > { %p1353_p11 = pnand %p1352_p5, %p1348_p13 }
  0x24   : > { %1356 = shalt.err (!%p1353_p11)
}
  0x25   : > { %s1447_s10 = smov 128   ;;  %s1448_s14 = smov 8  }
  0x26   : > { %1262 = dma.hbm_to_vmem [thread:$0]  (!%p1554_p9), %s186_s23, 4096, %s188_s25, %s175_s28, %s1447_s10, %s1447_s10, %s1448_s14  }
  0x27   : > { %199 = sbr.rel (%p1519_p8) target bundleno = 344 (0x158), region = 36  ;;  %s1571_s20 = sand.u32 (!%p1519_p8), 1, %s1434_s16  }
  0x28   : > { %s980_s24 = sshll.u32 (!%p1519_p8), %s1571_s20, 8  ;;  %s202_s30 = scalar_lea.sflag (!%p1519_p8), [#allocation3], %s1571_s20 }
  0x29   : > { %s1577_s5 = scalar_lea.vmem (!%p1519_p8), [#allocation2], %s980_s24 }
  0x2c   : > { %1417 = dma.done.wait (%p1506_p4), %s202_s30, 4096  }
  0x2d   : > { %1419 = vsyncadd (%p1506_p4), %s202_s30, 4294963200 }
  0x2e   : > { %1421 = dma.done.wait (%p42_p1), [#allocation6], 2048  }
  0x2f   : > { %1423 = vsyncadd (%p42_p1), [#allocation6], 4294965248  ;;  %v1221_v0 = vld [vmem:[#allocation5 + $0x38] sm:$0xff]  ;;  %v1220_v2 = vld [vmem:[#allocation5 + $0x30] sm:$0xff]  ;;  %s1665_s27 = scalar_lea.vmem [#allocation7], %s980_s24  ;;  %s1230_s28 = sshll.u32 %s1497_s19, 8 }
  0x30   : > { %v1229_v1 = vld [vmem:[#allocation5 + $0x78] sm:$0xff]  ;;  %558 = vmatpush.bf16.msra.mxu0 %v1221_v0  ;;  %1231 = vmatpush.bf16.msra.mxu2 %v1221_v0  ;;  %v1228_v3 = vld [vmem:[#allocation5 + $0x70] sm:$0xff]  ;;  %v1219_v4 = vld [vmem:[#allocation5 + $0x28] sm:$0xff]  ;;  %s884_s11 = scalar_lea.hbm %s1799_s4, %s1230_s28  ;;  %s885_s12 = sshll.u32 %s1665_s27, 4  ;;  %s886_s12 = int_to_ptr.vmem [resolvable:$true] %s885_s12 }
  0x31   : > { %647 = vmatpush.bf16.msra.mxu1 %v1229_v1  ;;  %1239 = vmatpush.bf16.msra.mxu3 %v1229_v1  ;;  %v1227_v5 = vld [vmem:[#allocation5 + $0x68] sm:$0xff]  ;;  %v1218_v6 = vld [vmem:[#allocation5 + $0x20] sm:$0xff]  ;;  %v1217_v8 = vld [vmem:[#allocation5 + $0x18] sm:$0xff]  ;;  %s887_s19 = sshll.u32 %s884_s11, 4  ;;  %s873_s13 = scalar_lea.sflag [#allocation4], %s1571_s20  ;;  %s888_s19 = int_to_ptr.hbm [resolvable:$true] %s887_s19 }
  0x32   : > { %v1226_v7 = vld [vmem:[#allocation5 + $0x60] sm:$0xff]  ;;  %v1225_v9 = vld [vmem:[#allocation5 + $0x58] sm:$0xff]  ;;  %v1216_v10 = vld [vmem:[#allocation5 + $0x10] sm:$0xff]  ;;  %s1386_s10 = sshra.s32 %s888_s19, 4  ;;  %s1387_s10 = int_to_ptr.hbm [resolvable:$true] %s1386_s10 }
  0x33   : > { %v1224_v11 = vld [vmem:[#allocation5 + $0x50] sm:$0xff]  ;;  %v1215_v12 = vld [vmem:[#allocation5 + $0x8] sm:$0xff]  ;;  %v1214_v14 = vld [vmem:[#allocation5] sm:$0xff]  ;;  %s1388_s14 = scalar_lea.hbm %s1387_s10, 256  ;;  %p1393_p11 = scmp.lt.s32.totalorder %s1387_s10, %s1799_s4 }
  0x34   : > { %559 = vmatpush.bf16.msra.mxu0 %v1220_v2  ;;  %1232 = vmatpush.bf16.msra.mxu2 %v1220_v2  ;;  %v1223_v13 = vld [vmem:[#allocation5 + $0x48] sm:$0xff]  ;;  %v1222_v15 = vld [vmem:[#allocation5 + $0x40] sm:$0xff]  ;;  %v993_v28 = vld [vmem:[%s1577_s5 + $0x10] sm:$0xf]  ;;  %p1389_p1 = scmp.ne.s32.totalorder %s1387_s10, %s1388_s14 }
  0x35   : > { %648 = vmatpush.bf16.msra.mxu1 %v1228_v3  ;;  %1240 = vmatpush.bf16.msra.mxu3 %v1228_v3  ;;  %v985_v16 = vld [vmem:[%s1577_s5] sm:$0xf]  ;;  %v1183_v17 = vld [vmem:[%s1577_s5 + $0x4] sm:$0xf0]  ;;  %v1182_v20 = vld [vmem:[%s1577_s5 + $0x4] sm:$0xf] }
  0x36   : > { %v1049_v18 = vld [vmem:[%s1577_s5 + $0x80] sm:$0xf]  ;;  %v1199_v19 = vld [vmem:[%s1577_s5 + $0x84] sm:$0xf0]  ;;  %v987_v21 = vld [vmem:[%s1577_s5 + $0x8] sm:$0xf0]  ;;  %v986_v24 = vor.u32 %v1183_v17, %v985_v16  ;;  %p1390_p4 = pnand %p1389_p1, %p1543_p7 }
  0x37   : > { %v1198_v22 = vld [vmem:[%s1577_s5 + $0x84] sm:$0xf]  ;;  %v1051_v23 = vld [vmem:[%s1577_s5 + $0x88] sm:$0xf0]  ;;  %v1050_v25 = vor.u32 %v1199_v19, %v1049_v18  ;;  %v990_v26 = vor.u32 %v1182_v20, %v987_v21  ;;  %v1185_v29 = vld [vmem:[%s1577_s5 + $0x14] sm:$0xf0] }
  0x38   : > { %560 = vmatpush.bf16.msra.mxu0 %v1219_v4  ;;  %1233 = vmatpush.bf16.msra.mxu2 %v1219_v4  ;;  %v1054_v27 = vor.u32 %v1198_v22, %v1051_v23  ;;  %v1057_v30 = vld [vmem:[%s1577_s5 + $0x90] sm:$0xf]  ;;  %v1201_v31 = vld [vmem:[%s1577_s5 + $0x94] sm:$0xf0]  ;;  %v1184_v32 = vld [vmem:[%s1577_s5 + $0x14] sm:$0xf]  ;;  %v994_v36 = vor.u32 %v1185_v29, %v993_v28  ;;  %p1391_p8 = pneg %p1390_p4 }
  0x39   : > { %649 = vmatpush.bf16.msra.mxu1 %v1227_v5  ;;  %1241 = vmatpush.bf16.msra.mxu3 %v1227_v5  ;;  %v995_v33 = vld [vmem:[%s1577_s5 + $0x18] sm:$0xf0]  ;;  %v1200_v34 = vld [vmem:[%s1577_s5 + $0x94] sm:$0xf]  ;;  %v1058_v37 = vor.u32 %v1201_v31, %v1057_v30  ;;  %v1001_v40 = vld [vmem:[%s1577_s5 + $0x20] sm:$0xf] }
  0x3a   : > { %v1059_v35 = vld [vmem:[%s1577_s5 + $0x98] sm:$0xf0]  ;;  %v998_v38 = vor.u32 %v1184_v32, %v995_v33  ;;  %v1187_v41 = vld [vmem:[%s1577_s5 + $0x24] sm:$0xf0]  ;;  %v1065_v42 = vld [vmem:[%s1577_s5 + $0xa0] sm:$0xf] }
  0x3b   : > { %v1062_v39 = vor.u32 %v1200_v34, %v1059_v35  ;;  %v1203_v43 = vld [vmem:[%s1577_s5 + $0xa4] sm:$0xf0]  ;;  %v1186_v44 = vld [vmem:[%s1577_s5 + $0x24] sm:$0xf]  ;;  %v1003_v45 = vld [vmem:[%s1577_s5 + $0x28] sm:$0xf0]  ;;  %v1002_v48 = vor.u32 %v1187_v41, %v1001_v40 }
  0x3c   : > { %561 = vmatpush.bf16.msra.mxu0 %v1218_v6  ;;  %1234 = vmatpush.bf16.msra.mxu2 %v1218_v6  ;;  %v1202_v46 = vld [vmem:[%s1577_s5 + $0xa4] sm:$0xf]  ;;  %v1067_v47 = vld [vmem:[%s1577_s5 + $0xa8] sm:$0xf0]  ;;  %v1066_v49 = vor.u32 %v1203_v43, %v1065_v42  ;;  %v1006_v50 = vor.u32 %v1186_v44, %v1003_v45  ;;  %v1009_v52 = vld [vmem:[%s1577_s5 + $0x30] sm:$0xf] }
  0x3d   : > { %650 = vmatpush.bf16.msra.mxu1 %v1226_v7  ;;  %1242 = vmatpush.bf16.msra.mxu3 %v1226_v7  ;;  %v1070_v51 = vor.u32 %v1202_v46, %v1067_v47  ;;  %v1189_v53 = vld [vmem:[%s1577_s5 + $0x34] sm:$0xf0]  ;;  %v1073_v54 = vld [vmem:[%s1577_s5 + $0xb0] sm:$0xf]  ;;  %v1188_v56 = vld [vmem:[%s1577_s5 + $0x34] sm:$0xf] }
  0x3e   : > { %v1205_v55 = vld [vmem:[%s1577_s5 + $0xb4] sm:$0xf0]  ;;  %v1011_v57 = vld [vmem:[%s1577_s5 + $0x38] sm:$0xf0]  ;;  %v1204_v58 = vld [vmem:[%s1577_s5 + $0xb4] sm:$0xf]  ;;  %v1010_v60 = vor.u32 %v1189_v53, %v1009_v52 }
  0x3f   : > { %v1075_v59 = vld [vmem:[%s1577_s5 + $0xb8] sm:$0xf0]  ;;  %v1074_v61 = vor.u32 %v1205_v55, %v1073_v54  ;;  %v1014_v62 = vor.u32 %v1188_v56, %v1011_v57  ;;  %v1017_v0 = vld [vmem:[%s1577_s5 + $0x40] sm:$0xf]  ;;  %v1191_v1 = vld [vmem:[%s1577_s5 + $0x44] sm:$0xf0] }
  0x40   : > { %562 = vmatpush.bf16.msra.mxu0 %v1217_v8  ;;  %1235 = vmatpush.bf16.msra.mxu2 %v1217_v8  ;;  %v1078_v63 = vor.u32 %v1204_v58, %v1075_v59  ;;  %v1081_v2 = vld [vmem:[%s1577_s5 + $0xc0] sm:$0xf]  ;;  %v1207_v3 = vld [vmem:[%s1577_s5 + $0xc4] sm:$0xf0]  ;;  %v1190_v4 = vld [vmem:[%s1577_s5 + $0x44] sm:$0xf]  ;;  %v1018_v8 = vor.u32 %v1191_v1, %v1017_v0 }
  0x41   : > { %651 = vmatpush.bf16.msra.mxu1 %v1225_v9  ;;  %1243 = vmatpush.bf16.msra.mxu3 %v1225_v9  ;;  %v1019_v5 = vld [vmem:[%s1577_s5 + $0x48] sm:$0xf0]  ;;  %v1206_v6 = vld [vmem:[%s1577_s5 + $0xc4] sm:$0xf]  ;;  %v1082_v9 = vor.u32 %v1207_v3, %v1081_v2  ;;  %v1192_v16 = vld [vmem:[%s1577_s5 + $0x54] sm:$0xf] }
  0x42   : > { %v1083_v7 = vld [vmem:[%s1577_s5 + $0xc8] sm:$0xf0]  ;;  %v1027_v17 = vld [vmem:[%s1577_s5 + $0x58] sm:$0xf0]  ;;  %v1208_v18 = vld [vmem:[%s1577_s5 + $0xd4] sm:$0xf] }
  0x43   : > { %v1091_v19 = vld [vmem:[%s1577_s5 + $0xd8] sm:$0xf0]  ;;  %v1030_v22 = vor.u32 %v1192_v16, %v1027_v17  ;;  %v1194_v28 = vld [vmem:[%s1577_s5 + $0x64] sm:$0xf]  ;;  %v1035_v29 = vld [vmem:[%s1577_s5 + $0x68] sm:$0xf0] }
  0x44   : > { %563 = vmatpush.bf16.msra.mxu0 %v1216_v10  ;;  %1236 = vmatpush.bf16.msra.mxu2 %v1216_v10  ;;  %v1022_v10 = vor.u32 %v1190_v4, %v1019_v5  ;;  %v1094_v23 = vor.u32 %v1208_v18, %v1091_v19  ;;  %v1210_v30 = vld [vmem:[%s1577_s5 + $0xe4] sm:$0xf]  ;;  %v1099_v31 = vld [vmem:[%s1577_s5 + $0xe8] sm:$0xf0]  ;;  %v1038_v34 = vor.u32 %v1194_v28, %v1035_v29  ;;  %v1196_v40 = vld [vmem:[%s1577_s5 + $0x74] sm:$0xf] }
  0x45   : > { %652 = vmatpush.bf16.msra.mxu1 %v1224_v11  ;;  %1244 = vmatpush.bf16.msra.mxu3 %v1224_v11  ;;  %v1086_v11 = vor.u32 %v1206_v6, %v1083_v7  ;;  %v1102_v35 = vor.u32 %v1210_v30, %v1099_v31  ;;  %v1043_v41 = vld [vmem:[%s1577_s5 + $0x78] sm:$0xf0]  ;;  %v1212_v42 = vld [vmem:[%s1577_s5 + $0xf4] sm:$0xf]  ;;  %v1659_v52 = vld [vmem:[%s1798_s3] ss:$0 sm:$0xff] }
  0x46   : > { %v1107_v43 = vld [vmem:[%s1577_s5 + $0xf8] sm:$0xf0]  ;;  %v1046_v46 = vor.u32 %v1196_v40, %v1043_v41 }
  0x47   : > { %v1110_v47 = vor.u32 %v1212_v42, %v1107_v43 }
  0x48   : > { %564 = vmatpush.bf16.msra.mxu0 %v1215_v12  ;;  %1237 = vmatpush.bf16.msra.mxu2 %v1215_v12  ;;  %v1025_v12 = vld [vmem:[%s1577_s5 + $0x50] sm:$0xf] }
  0x49   : > { %653 = vmatpush.bf16.msra.mxu1 %v1223_v13  ;;  %1245 = vmatpush.bf16.msra.mxu3 %v1223_v13  ;;  %v1193_v13 = vld [vmem:[%s1577_s5 + $0x54] sm:$0xf0] }
  0x4a   : > { %v1026_v20 = vor.u32 %v1193_v13, %v1025_v12 }
  0x4c   : > { %565 = vmatpush.bf16.msra.mxu0 %v1214_v14  ;;  %1238 = vmatpush.bf16.msra.mxu2 %v1214_v14  ;;  %v1089_v14 = vld [vmem:[%s1577_s5 + $0xd0] sm:$0xf] }
  0x4d   : > { %654 = vmatpush.bf16.msra.mxu1 %v1222_v15  ;;  %1246 = vmatpush.bf16.msra.mxu3 %v1222_v15  ;;  %v1209_v15 = vld [vmem:[%s1577_s5 + $0xd4] sm:$0xf0] }
  0x4e   : > { %v1090_v21 = vor.u32 %v1209_v15, %v1089_v14 }
  0x4f   : > { %566 = vmatmul.bf16.vlgmr.msra.gmra.mxu0 %v986_v24  ;;  %606 = vmatmul.bf16.vlgmr.msra.gmra.mxu2 %v1050_v25  ;;  %v1033_v24 = vld [vmem:[%s1577_s5 + $0x60] sm:$0xf]  ;;  %v1195_v25 = vld [vmem:[%s1577_s5 + $0x64] sm:$0xf0] }
  0x50   : > { %655 = vmatmul.bf16.vlgmr.msra.gmra.mxu1 %v990_v26  ;;  %695 = vmatmul.bf16.vlgmr.msra.gmra.mxu3 %v1054_v27  ;;  %v1097_v26 = vld [vmem:[%s1577_s5 + $0xe0] sm:$0xf]  ;;  %v1211_v27 = vld [vmem:[%s1577_s5 + $0xe4] sm:$0xf0]  ;;  %v1034_v32 = vor.u32 %v1195_v25, %v1033_v24 }
  0x51   : > { %v1098_v33 = vor.u32 %v1211_v27, %v1097_v26 }
  0x5f   : > { %571 = vmatmul.bf16.gmra.mxu0 %v994_v36  ;;  %611 = vmatmul.bf16.gmra.mxu2 %v1058_v37  ;;  %v1041_v36 = vld [vmem:[%s1577_s5 + $0x70] sm:$0xf]  ;;  %v1197_v37 = vld [vmem:[%s1577_s5 + $0x74] sm:$0xf0] }
  0x60   : > { %660 = vmatmul.bf16.gmra.mxu1 %v998_v38  ;;  %700 = vmatmul.bf16.gmra.mxu3 %v1062_v39  ;;  %v1105_v38 = vld [vmem:[%s1577_s5 + $0xf0] sm:$0xf]  ;;  %v1213_v39 = vld [vmem:[%s1577_s5 + $0xf4] sm:$0xf0]  ;;  %v1042_v44 = vor.u32 %v1197_v37, %v1041_v36  ;;  %s1392_s5 = scalar_lea.hbm %s1799_s4, 512 }
  0x61   : > { %v1106_v45 = vor.u32 %v1213_v39, %v1105_v38  ;;  %p1394_p9 = scmp.lt.s32.totalorder %s1392_s5, %s1388_s14 }
  0x63   : > { %p1395_p2 = por %p1394_p9, %p1393_p11 }
  0x65   : > { %p1396_p10 = pnand %p1395_p2, %p1391_p8 }
  0x6f   : > { %576 = vmatmul.bf16.gmra.mxu0 %v1002_v48  ;;  %616 = vmatmul.bf16.gmra.mxu2 %v1066_v49  ;;  %v1654_v49 = vld [vmem:[%s1797_s2] ss:$0 sm:$0xff] }
  0x70   : > { %665 = vmatmul.bf16.gmra.mxu1 %v1006_v50  ;;  %705 = vmatmul.bf16.gmra.mxu3 %v1070_v51 }
  0x7f   : > { %581 = vmatmul.bf16.gmra.mxu0 %v1010_v60  ;;  %621 = vmatmul.bf16.gmra.mxu2 %v1074_v61 }
  0x80   : > { %670 = vmatmul.bf16.gmra.mxu1 %v1014_v62  ;;  %710 = vmatmul.bf16.gmra.mxu3 %v1078_v63 }
  0x8f   : > { %586 = vmatmul.bf16.gmra.mxu0 %v1018_v8  ;;  %626 = vmatmul.bf16.gmra.mxu2 %v1082_v9 }
  0x90   : > { %675 = vmatmul.bf16.gmra.mxu1 %v1022_v10  ;;  %715 = vmatmul.bf16.gmra.mxu3 %v1086_v11 }
  0x9f   : > { %591 = vmatmul.bf16.gmra.mxu0 %v1026_v20  ;;  %631 = vmatmul.bf16.gmra.mxu2 %v1090_v21 }
  0xa0   : > { %680 = vmatmul.bf16.gmra.mxu1 %v1030_v22  ;;  %720 = vmatmul.bf16.gmra.mxu3 %v1094_v23 }
  0xaf   : > { %596 = vmatmul.bf16.gmra.mxu0 %v1034_v32  ;;  %636 = vmatmul.bf16.gmra.mxu2 %v1098_v33 }
  0xb0   : > { %685 = vmatmul.bf16.gmra.mxu1 %v1038_v34  ;;  %725 = vmatmul.bf16.gmra.mxu3 %v1102_v35 }
  0xbf   : > { %601 = vmatmul.bf16.gmra.mxu0 %v1042_v44  ;;  %641 = vmatmul.bf16.gmra.mxu2 %v1106_v45 }
  0xc0   : > { %690 = vmatmul.bf16.gmra.mxu1 %v1046_v46  ;;  %730 = vmatmul.bf16.gmra.mxu3 %v1110_v47 }
  0xcc   : > { %v567_v48 = vpop.f32.mrf.mxu0 }
  0xcd   : > { %v656_v50 = vpop.f32.mrf.mxu1 }
  0xce   : > { %v657_v51 = vadd.f32 %v656_v50, %v567_v48 }
  0xd0   : > { %v740_v53 = vmul.f32 %v1654_v49, %v657_v51 }
  0xd2   : > { %v776_v54 = vadd.f32 %v1659_v52, %v740_v53  ;;  %v607_v55 = vpop.f32.mrf.mxu2 }
  0xd3   : > { %v696_v56 = vpop.f32.mrf.mxu3 }
  0xd4   : > { %v808_v57 = vmax.f32 %v776_v54, 0.0  ;;  %v697_v58 = vadd.f32 %v696_v56, %v607_v55  ;;  %v569_v59 = vpop.f32.mrf.mxu0 }
  0xd5   : > { %v658_v60 = vpop.f32.mrf.mxu1 }
  0xd6   : > { %840 = vst [vmem:[%s1665_s27] sm:$0xff] %v808_v57  ;;  %v756_v61 = vmul.f32 %v1654_v49, %v697_v58  ;;  %v659_v62 = vadd.f32 %v658_v60, %v569_v59 }
  0xd8   : > { %v792_v63 = vadd.f32 %v1659_v52, %v756_v61  ;;  %v741_v0 = vmul.f32 %v1654_v49, %v659_v62 }
  0xda   : > { %v824_v1 = vmax.f32 %v792_v63, 0.0  ;;  %v777_v2 = vadd.f32 %v1659_v52, %v741_v0  ;;  %v609_v3 = vpop.f32.mrf.mxu2 }
  0xdb   : > { %v698_v4 = vpop.f32.mrf.mxu3 }
  0xdc   : > { %856 = vst [vmem:[%s1665_s27 + $0x80] sm:$0xff] %v824_v1  ;;  %v809_v5 = vmax.f32 %v777_v2, 0.0  ;;  %v699_v6 = vadd.f32 %v698_v4, %v609_v3  ;;  %v572_v7 = vpop.f32.mrf.mxu0 }
  0xdd   : > { %v661_v8 = vpop.f32.mrf.mxu1 }
  0xde   : > { %841 = vst [vmem:[%s1665_s27 + $0x8] sm:$0xff] %v809_v5  ;;  %v757_v9 = vmul.f32 %v1654_v49, %v699_v6  ;;  %v662_v10 = vadd.f32 %v661_v8, %v572_v7 }
  0xe0   : > { %v793_v11 = vadd.f32 %v1659_v52, %v757_v9  ;;  %v742_v12 = vmul.f32 %v1654_v49, %v662_v10 }
  0xe2   : > { %v825_v13 = vmax.f32 %v793_v11, 0.0  ;;  %v778_v14 = vadd.f32 %v1659_v52, %v742_v12  ;;  %v612_v15 = vpop.f32.mrf.mxu2 }
  0xe3   : > { %v701_v16 = vpop.f32.mrf.mxu3 }
  0xe4   : > { %857 = vst [vmem:[%s1665_s27 + $0x88] sm:$0xff] %v825_v13  ;;  %v810_v17 = vmax.f32 %v778_v14, 0.0  ;;  %v702_v18 = vadd.f32 %v701_v16, %v612_v15  ;;  %v574_v19 = vpop.f32.mrf.mxu0 }
  0xe5   : > { %v663_v20 = vpop.f32.mrf.mxu1 }
  0xe6   : > { %842 = vst [vmem:[%s1665_s27 + $0x10] sm:$0xff] %v810_v17  ;;  %v758_v21 = vmul.f32 %v1654_v49, %v702_v18  ;;  %v664_v22 = vadd.f32 %v663_v20, %v574_v19 }
  0xe8   : > { %v794_v23 = vadd.f32 %v1659_v52, %v758_v21  ;;  %v743_v24 = vmul.f32 %v1654_v49, %v664_v22 }
  0xea   : > { %v826_v25 = vmax.f32 %v794_v23, 0.0  ;;  %v779_v26 = vadd.f32 %v1659_v52, %v743_v24  ;;  %v614_v27 = vpop.f32.mrf.mxu2 }
  0xeb   : > { %v703_v28 = vpop.f32.mrf.mxu3 }
  0xec   : > { %858 = vst [vmem:[%s1665_s27 + $0x90] sm:$0xff] %v826_v25  ;;  %v811_v29 = vmax.f32 %v779_v26, 0.0  ;;  %v704_v30 = vadd.f32 %v703_v28, %v614_v27  ;;  %v577_v31 = vpop.f32.mrf.mxu0 }
  0xed   : > { %v666_v32 = vpop.f32.mrf.mxu1 }
  0xee   : > { %843 = vst [vmem:[%s1665_s27 + $0x18] sm:$0xff] %v811_v29  ;;  %v759_v33 = vmul.f32 %v1654_v49, %v704_v30  ;;  %v667_v34 = vadd.f32 %v666_v32, %v577_v31 }
  0xf0   : > { %v795_v35 = vadd.f32 %v1659_v52, %v759_v33  ;;  %v744_v36 = vmul.f32 %v1654_v49, %v667_v34 }
  0xf2   : > { %v827_v37 = vmax.f32 %v795_v35, 0.0  ;;  %v780_v38 = vadd.f32 %v1659_v52, %v744_v36  ;;  %v617_v39 = vpop.f32.mrf.mxu2 }
  0xf3   : > { %v706_v40 = vpop.f32.mrf.mxu3 }
  0xf4   : > { %859 = vst [vmem:[%s1665_s27 + $0x98] sm:$0xff] %v827_v37  ;;  %v812_v41 = vmax.f32 %v780_v38, 0.0  ;;  %v707_v42 = vadd.f32 %v706_v40, %v617_v39  ;;  %v579_v43 = vpop.f32.mrf.mxu0 }
  0xf5   : > { %v668_v44 = vpop.f32.mrf.mxu1 }
  0xf6   : > { %844 = vst [vmem:[%s1665_s27 + $0x20] sm:$0xff] %v812_v41  ;;  %v760_v45 = vmul.f32 %v1654_v49, %v707_v42  ;;  %v669_v46 = vadd.f32 %v668_v44, %v579_v43 }
  0xf8   : > { %v796_v47 = vadd.f32 %v1659_v52, %v760_v45  ;;  %v745_v48 = vmul.f32 %v1654_v49, %v669_v46 }
  0xfa   : > { %v828_v50 = vmax.f32 %v796_v47, 0.0  ;;  %v781_v51 = vadd.f32 %v1659_v52, %v745_v48  ;;  %v619_v53 = vpop.f32.mrf.mxu2 }
  0xfb   : > { %v708_v54 = vpop.f32.mrf.mxu3 }
  0xfc   : > { %860 = vst [vmem:[%s1665_s27 + $0xa0] sm:$0xff] %v828_v50  ;;  %v813_v55 = vmax.f32 %v781_v51, 0.0  ;;  %v709_v56 = vadd.f32 %v708_v54, %v619_v53  ;;  %v582_v57 = vpop.f32.mrf.mxu0 }
  0xfd   : > { %v671_v58 = vpop.f32.mrf.mxu1 }
  0xfe   : > { %845 = vst [vmem:[%s1665_s27 + $0x28] sm:$0xff] %v813_v55  ;;  %v761_v59 = vmul.f32 %v1654_v49, %v709_v56  ;;  %v672_v60 = vadd.f32 %v671_v58, %v582_v57 }
 0x100   : > { %v797_v61 = vadd.f32 %v1659_v52, %v761_v59  ;;  %v746_v62 = vmul.f32 %v1654_v49, %v672_v60 }
 0x102   : > { %v829_v63 = vmax.f32 %v797_v61, 0.0  ;;  %v782_v0 = vadd.f32 %v1659_v52, %v746_v62  ;;  %v622_v1 = vpop.f32.mrf.mxu2 }
 0x103   : > { %v711_v2 = vpop.f32.mrf.mxu3 }
 0x104   : > { %861 = vst [vmem:[%s1665_s27 + $0xa8] sm:$0xff] %v829_v63  ;;  %v814_v3 = vmax.f32 %v782_v0, 0.0  ;;  %v712_v4 = vadd.f32 %v711_v2, %v622_v1  ;;  %v584_v5 = vpop.f32.mrf.mxu0 }
 0x105   : > { %v673_v6 = vpop.f32.mrf.mxu1 }
 0x106   : > { %846 = vst [vmem:[%s1665_s27 + $0x30] sm:$0xff] %v814_v3  ;;  %v762_v7 = vmul.f32 %v1654_v49, %v712_v4  ;;  %v674_v8 = vadd.f32 %v673_v6, %v584_v5 }
 0x108   : > { %v798_v9 = vadd.f32 %v1659_v52, %v762_v7  ;;  %v747_v10 = vmul.f32 %v1654_v49, %v674_v8 }
 0x10a   : > { %v830_v11 = vmax.f32 %v798_v9, 0.0  ;;  %v783_v12 = vadd.f32 %v1659_v52, %v747_v10  ;;  %v624_v13 = vpop.f32.mrf.mxu2 }
 0x10b   : > { %v713_v14 = vpop.f32.mrf.mxu3 }
 0x10c   : > { %862 = vst [vmem:[%s1665_s27 + $0xb0] sm:$0xff] %v830_v11  ;;  %v815_v15 = vmax.f32 %v783_v12, 0.0  ;;  %v714_v16 = vadd.f32 %v713_v14, %v624_v13  ;;  %v587_v17 = vpop.f32.mrf.mxu0 }
 0x10d   : > { %v676_v18 = vpop.f32.mrf.mxu1 }
 0x10e   : > { %847 = vst [vmem:[%s1665_s27 + $0x38] sm:$0xff] %v815_v15  ;;  %v763_v19 = vmul.f32 %v1654_v49, %v714_v16  ;;  %v677_v20 = vadd.f32 %v676_v18, %v587_v17 }
 0x110   : > { %v799_v21 = vadd.f32 %v1659_v52, %v763_v19  ;;  %v748_v22 = vmul.f32 %v1654_v49, %v677_v20 }
 0x112   : > { %v831_v23 = vmax.f32 %v799_v21, 0.0  ;;  %v784_v24 = vadd.f32 %v1659_v52, %v748_v22  ;;  %v627_v25 = vpop.f32.mrf.mxu2 }
 0x113   : > { %v716_v26 = vpop.f32.mrf.mxu3 }
 0x114   : > { %863 = vst [vmem:[%s1665_s27 + $0xb8] sm:$0xff] %v831_v23  ;;  %v816_v27 = vmax.f32 %v784_v24, 0.0  ;;  %v717_v28 = vadd.f32 %v716_v26, %v627_v25  ;;  %v589_v29 = vpop.f32.mrf.mxu0 }
 0x115   : > { %v678_v30 = vpop.f32.mrf.mxu1 }
 0x116   : > { %848 = vst [vmem:[%s1665_s27 + $0x40] sm:$0xff] %v816_v27  ;;  %v764_v31 = vmul.f32 %v1654_v49, %v717_v28  ;;  %v679_v32 = vadd.f32 %v678_v30, %v589_v29 }
 0x118   : > { %v800_v33 = vadd.f32 %v1659_v52, %v764_v31  ;;  %v749_v34 = vmul.f32 %v1654_v49, %v679_v32 }
 0x11a   : > { %v832_v35 = vmax.f32 %v800_v33, 0.0  ;;  %v785_v36 = vadd.f32 %v1659_v52, %v749_v34  ;;  %v629_v37 = vpop.f32.mrf.mxu2 }
 0x11b   : > { %v718_v38 = vpop.f32.mrf.mxu3 }
 0x11c   : > { %864 = vst [vmem:[%s1665_s27 + $0xc0] sm:$0xff] %v832_v35  ;;  %v817_v39 = vmax.f32 %v785_v36, 0.0  ;;  %v719_v40 = vadd.f32 %v718_v38, %v629_v37  ;;  %v592_v41 = vpop.f32.mrf.mxu0 }
 0x11d   : > { %v681_v42 = vpop.f32.mrf.mxu1 }
 0x11e   : > { %849 = vst [vmem:[%s1665_s27 + $0x48] sm:$0xff] %v817_v39  ;;  %v765_v43 = vmul.f32 %v1654_v49, %v719_v40  ;;  %v682_v44 = vadd.f32 %v681_v42, %v592_v41 }
 0x120   : > { %v801_v45 = vadd.f32 %v1659_v52, %v765_v43  ;;  %v750_v46 = vmul.f32 %v1654_v49, %v682_v44 }
 0x122   : > { %v833_v47 = vmax.f32 %v801_v45, 0.0  ;;  %v786_v48 = vadd.f32 %v1659_v52, %v750_v46  ;;  %v632_v50 = vpop.f32.mrf.mxu2 }
 0x123   : > { %v721_v51 = vpop.f32.mrf.mxu3 }
 0x124   : > { %865 = vst [vmem:[%s1665_s27 + $0xc8] sm:$0xff] %v833_v47  ;;  %v818_v53 = vmax.f32 %v786_v48, 0.0  ;;  %v722_v54 = vadd.f32 %v721_v51, %v632_v50  ;;  %v594_v55 = vpop.f32.mrf.mxu0 }
 0x125   : > { %v683_v56 = vpop.f32.mrf.mxu1 }
 0x126   : > { %850 = vst [vmem:[%s1665_s27 + $0x50] sm:$0xff] %v818_v53  ;;  %v766_v57 = vmul.f32 %v1654_v49, %v722_v54  ;;  %v684_v58 = vadd.f32 %v683_v56, %v594_v55 }
 0x128   : > { %v802_v59 = vadd.f32 %v1659_v52, %v766_v57  ;;  %v751_v60 = vmul.f32 %v1654_v49, %v684_v58 }
 0x12a   : > { %v834_v61 = vmax.f32 %v802_v59, 0.0  ;;  %v787_v62 = vadd.f32 %v1659_v52, %v751_v60  ;;  %v634_v63 = vpop.f32.mrf.mxu2 }
 0x12b   : > { %v723_v0 = vpop.f32.mrf.mxu3 }
 0x12c   : > { %866 = vst [vmem:[%s1665_s27 + $0xd0] sm:$0xff] %v834_v61  ;;  %v819_v1 = vmax.f32 %v787_v62, 0.0  ;;  %v724_v2 = vadd.f32 %v723_v0, %v634_v63  ;;  %v597_v3 = vpop.f32.mrf.mxu0 }
 0x12d   : > { %v686_v4 = vpop.f32.mrf.mxu1 }
 0x12e   : > { %851 = vst [vmem:[%s1665_s27 + $0x58] sm:$0xff] %v819_v1  ;;  %v767_v5 = vmul.f32 %v1654_v49, %v724_v2  ;;  %v687_v6 = vadd.f32 %v686_v4, %v597_v3 }
 0x130   : > { %v803_v7 = vadd.f32 %v1659_v52, %v767_v5  ;;  %v752_v8 = vmul.f32 %v1654_v49, %v687_v6 }
 0x132   : > { %v835_v9 = vmax.f32 %v803_v7, 0.0  ;;  %v788_v10 = vadd.f32 %v1659_v52, %v752_v8  ;;  %v637_v11 = vpop.f32.mrf.mxu2 }
 0x133   : > { %v726_v12 = vpop.f32.mrf.mxu3 }
 0x134   : > { %867 = vst [vmem:[%s1665_s27 + $0xd8] sm:$0xff] %v835_v9  ;;  %v820_v13 = vmax.f32 %v788_v10, 0.0  ;;  %v727_v14 = vadd.f32 %v726_v12, %v637_v11  ;;  %v599_v15 = vpop.f32.mrf.mxu0 }
 0x135   : > { %v688_v16 = vpop.f32.mrf.mxu1 }
 0x136   : > { %852 = vst [vmem:[%s1665_s27 + $0x60] sm:$0xff] %v820_v13  ;;  %v768_v17 = vmul.f32 %v1654_v49, %v727_v14  ;;  %v689_v18 = vadd.f32 %v688_v16, %v599_v15 }
 0x138   : > { %v804_v19 = vadd.f32 %v1659_v52, %v768_v17  ;;  %v753_v20 = vmul.f32 %v1654_v49, %v689_v18 }
 0x13a   : > { %v836_v21 = vmax.f32 %v804_v19, 0.0  ;;  %v789_v22 = vadd.f32 %v1659_v52, %v753_v20  ;;  %v639_v23 = vpop.f32.mrf.mxu2 }
 0x13b   : > { %v728_v24 = vpop.f32.mrf.mxu3 }
 0x13c   : > { %868 = vst [vmem:[%s1665_s27 + $0xe0] sm:$0xff] %v836_v21  ;;  %v821_v25 = vmax.f32 %v789_v22, 0.0  ;;  %v729_v26 = vadd.f32 %v728_v24, %v639_v23  ;;  %v602_v27 = vpop.f32.mrf.mxu0 }
 0x13d   : > { %v691_v28 = vpop.f32.mrf.mxu1 }
 0x13e   : > { %853 = vst [vmem:[%s1665_s27 + $0x68] sm:$0xff] %v821_v25  ;;  %v769_v29 = vmul.f32 %v1654_v49, %v729_v26  ;;  %v692_v30 = vadd.f32 %v691_v28, %v602_v27 }
 0x140   : > { %v805_v31 = vadd.f32 %v1659_v52, %v769_v29  ;;  %v754_v32 = vmul.f32 %v1654_v49, %v692_v30 }
 0x142   : > { %v837_v33 = vmax.f32 %v805_v31, 0.0  ;;  %v790_v34 = vadd.f32 %v1659_v52, %v754_v32  ;;  %v642_v35 = vpop.f32.mrf.mxu2 }
 0x143   : > { %v731_v36 = vpop.f32.mrf.mxu3 }
 0x144   : > { %869 = vst [vmem:[%s1665_s27 + $0xe8] sm:$0xff] %v837_v33  ;;  %v822_v37 = vmax.f32 %v790_v34, 0.0  ;;  %v732_v38 = vadd.f32 %v731_v36, %v642_v35  ;;  %v604_v39 = vpop.f32.mrf.mxu0 }
 0x145   : > { %v693_v40 = vpop.f32.mrf.mxu1 }
 0x146   : > { %854 = vst [vmem:[%s1665_s27 + $0x70] sm:$0xff] %v822_v37  ;;  %v770_v41 = vmul.f32 %v1654_v49, %v732_v38  ;;  %v694_v42 = vadd.f32 %v693_v40, %v604_v39 }
 0x148   : > { %v806_v43 = vadd.f32 %v1659_v52, %v770_v41  ;;  %v755_v44 = vmul.f32 %v1654_v49, %v694_v42 }
 0x14a   : > { %v838_v45 = vmax.f32 %v806_v43, 0.0  ;;  %v791_v46 = vadd.f32 %v1659_v52, %v755_v44  ;;  %v644_v47 = vpop.f32.mrf.mxu2 }
 0x14b   : > { %v733_v48 = vpop.f32.mrf.mxu3 }
 0x14c   : > { %870 = vst [vmem:[%s1665_s27 + $0xf0] sm:$0xff] %v838_v45  ;;  %v823_v50 = vmax.f32 %v791_v46, 0.0  ;;  %v734_v51 = vadd.f32 %v733_v48, %v644_v47 }
 0x14e   : > { %855 = vst [vmem:[%s1665_s27 + $0x78] sm:$0xff] %v823_v50  ;;  %v771_v53 = vmul.f32 %v1654_v49, %v734_v51 }
 0x150   : > { %v807_v54 = vadd.f32 %v1659_v52, %v771_v53 }
 0x152   : > { %v839_v55 = vmax.f32 %v807_v54, 0.0 }
 0x154   : > { %871 = vst [vmem:[%s1665_s27 + $0xf8] sm:$0xff] %v839_v55 }
 0x155   : > { %1399 = shalt.err (!%p1396_p10)
}
 0x156   : > { %s1449_s20 = smov 128   ;;  %s1450_s23 = smov 8  }
 0x157   : > { %1253 = dma.vmem_to_hbm [thread:$0]  (%p1543_p7), %s886_s12, 4096, %s888_s19, %s873_s13, %s1449_s20, %s1449_s20, %s1450_s23  }
 0x158 PF: > { %s902_s25 = sand.u32 1, %s1430_s15   ;;  %p1805_p12 = scmp.ge.s32.totalorder %s1442_s18, 2 }
 0x159   : > { %s903_s27 = scalar_lea.sflag [#allocation4], %s902_s25 }
 0x15a   : > { %p1264_p13 = pnand %p1805_p12, %p1511_p6 }
 0x15c   : > { %p1265_p0 = pneg %p1264_p13 }
 0x15e   : > { %1425 = dma.done.wait (%p1265_p0), %s903_s27, 4096  }
 0x15f   : > { %1427 = vsyncadd (%p1265_p0), %s903_s27, 4294963200  ;;  %p18_p3 = scmp.ge.s32.totalorder %s1529_s29, 4   ;;  %s1806_s15 = smov %s1434_s16 }
 0x160   : > { %s1807_s16 = smov %s1438_s17  ;;  %s1808_s17 = smov %s1539_s8 }
 0x161   : > { %s1809_s18 = smov %s1529_s29  ;;  %20 = sbr.rel (!%p18_p3) target bundleno = 6 (0x6), region = 85 }
 0x166   :  { %909 = vsyncpa [#allocation3], 1 }
 0x167   :  { %911 = vsyncpa [#allocation3 + $0x1], 1 }
 0x168   :  { %912 = vsyncpa [#allocation6], 1 }
 0x169   :  { %913 = vsyncpa [#allocation4], 1 }
 0x16a   :  { %915 = vsyncpa [#allocation4 + $0x1], 1 }

</bundles_post_ra>
